<compile_context>
chip_gen: v6e
topology: v6e:2x2x1
jax: 0.10.0
libtpu: 0.0.40
codegen_flags: <defaults>
</compile_context>

<pallas_src>
import functools

import jax
import jax.numpy as jnp
from jax import lax
from jax.experimental import pallas as pl
from jax.experimental.pallas import tpu as pltpu

TEMPERATURE = 0.5
EPS = 1e-12  # matches torch.nn.functional.normalize default eps


def _normalize_kernel(zi_ref, zj_ref, z_ref, pos_ref, *, inv_temp):
    """L2-normalize a (TB, Dp) tile of both views; emit bf16 rows + pos-sum."""
    zi = zi_ref[...].astype(jnp.float32)          # (TB, Dp)
    zj = zj_ref[...].astype(jnp.float32)          # (TB, Dp)

    ni = jnp.sqrt(jnp.sum(zi * zi, axis=1, keepdims=True))
    nj = jnp.sqrt(jnp.sum(zj * zj, axis=1, keepdims=True))
    zi_n = zi / jnp.maximum(ni, EPS)              # torch eps clamp semantics
    zj_n = zj / jnp.maximum(nj, EPS)

    z_ref[0] = zi_n.astype(z_ref.dtype)           # bf16 rows for the MXU
    z_ref[1] = zj_n.astype(z_ref.dtype)

    # Partial sum of positive-pair similarities, already divided by T.
    pos_partial = jnp.sum(zi_n * zj_n) * inv_temp
    pos_ref[...] = jnp.full(pos_ref.shape, pos_partial, dtype=pos_ref.dtype)


def _loss_tile_kernel(z_rows_ref, z_all_ref, out_ref, *, inv_temp):
    """One (TM, N) slab of exp(Gram/T): row sums minus diagonal -> sum(log)."""
    zr = z_rows_ref[...]                          # (TM, Dp) bf16
    za = z_all_ref[...]                           # (N,  Dp) bf16, resident

    # A @ B^T without materializing a transposed copy: contract last dims.
    sim = lax.dot_general(
        zr, za,
        dimension_numbers=(((1,), (1,)), ((), ())),
        preferred_element_type=jnp.float32) * inv_temp      # (TM, N) f32

    # |sim| <= 1/T (cosine similarities), so exp never overflows for T=0.5.
    e = jnp.exp(sim)
    row_sum = jnp.sum(e, axis=1, keepdims=True)              # (TM, 1)

    # Remove the diagonal exactly: self-similarity of the (bf16-rounded) rows.
    zr_f = zr.astype(jnp.float32)
    self_sim = jnp.sum(zr_f * zr_f, axis=1, keepdims=True) * inv_temp
    denom = row_sum - jnp.exp(self_sim)                      # (TM, 1)

    partial = jnp.sum(jnp.log(denom))

    # Lane-dense, per-tile output slot (no accumulator carried across grid).
    out_ref[...] = jnp.full(out_ref.shape, partial, dtype=out_ref.dtype)


def _pick_tile(n, bytes_per_row, budget=8 * 1024 * 1024):
    """Largest tile (multiple of 8, divides n) whose working set fits budget."""
    cap = max(8, budget // max(int(bytes_per_row), 1))
    for t in (1024, 512, 256, 128, 64, 32, 16, 8):
        if t <= cap and n % t == 0:
            return t
    return n  # tiny / odd n: single full-extent block (still legal BlockSpec)


def nt_xent_loss(z_i, z_j, temperature=TEMPERATURE):
    z_i = z_i.astype(jnp.float32)
    z_j = z_j.astype(jnp.float32)
    B, D = z_i.shape
    N = 2 * B
    inv_temp = 1.0 / float(temperature)

    # Zero-pad feature dim to a multiple of 128 lanes (layout plumbing only).
    Dp = ((D + 127) // 128) * 128
    if Dp != D:
        pad = ((0, 0), (0, Dp - D))
        z_i = jnp.pad(z_i, pad)
        z_j = jnp.pad(z_j, pad)

    # ---- Kernel 1: normalize (row-tiled) + positive-pair partial sums -----
    TB = _pick_tile(B, 12 * Dp)          # ~2 f32 in + 1 bf16x2 out per row
    ntb = B // TB

    z3, pos_part = pl.pallas_call(
        functools.partial(_normalize_kernel, inv_temp=inv_temp),
        out_shape=(
            jax.ShapeDtypeStruct((2, B, Dp), jnp.bfloat16),
            jax.ShapeDtypeStruct((ntb, 8, 128), jnp.float32),
        ),
        grid_spec=pltpu.PrefetchScalarGridSpec(
            num_scalar_prefetch=0,
            grid=(ntb,),
            in_specs=[
                pl.BlockSpec((TB, Dp), lambda t: (t, 0)),
                pl.BlockSpec((TB, Dp), lambda t: (t, 0)),
            ],
            out_specs=[
                pl.BlockSpec((2, TB, Dp), lambda t: (0, t, 0)),
                pl.BlockSpec((1, 8, 128), lambda t: (t, 0, 0)),
            ],
        ),
        compiler_params=pltpu.CompilerParams(
            dimension_semantics=("parallel",)),
    )(z_i, z_j)

    # (2, B, Dp) -> (N, Dp) is the [zi_n; zj_n] concat; contiguous, no copy.
    z_b = z3.reshape(N, Dp)
    pos_sum = jnp.sum(pos_part[:, 0, 0])           # sum_i (zi_n . zj_n) / T

    # ---- Kernel 2: row-tiled Gram / exp / log-denominator -----------------
    TM = _pick_tile(N, 4 * N + 6 * Dp)             # (TM,N) f32 slab dominates
    nt = N // TM

    log_denom_part = pl.pallas_call(
        functools.partial(_loss_tile_kernel, inv_temp=inv_temp),
        out_shape=jax.ShapeDtypeStruct((nt, 8, 128), jnp.float32),
        grid_spec=pltpu.PrefetchScalarGridSpec(
            num_scalar_prefetch=0,
            grid=(nt,),
            in_specs=[
                pl.BlockSpec((TM, Dp), lambda t: (t, 0)),   # row tile (bf16)
                pl.BlockSpec((N, Dp), lambda t: (0, 0)),    # resident columns
            ],
            out_specs=pl.BlockSpec((1, 8, 128), lambda t: (t, 0, 0)),
        ),
        compiler_params=pltpu.CompilerParams(
            dimension_semantics=("parallel",),              # 2 TCs on v7x
            vmem_limit_bytes=48 * 1024 * 1024,
        ),
    )(z_b, z_b)

    total_log_denom = jnp.sum(log_denom_part[:, 0, 0])
    # mean_r [ log(denom_r) - pos_r/T ]  with sum_r pos_r/T == 2 * pos_sum
    return (total_log_denom - 2.0 * pos_sum) / jnp.float32(N)


def nt_xent_reference(z_i, z_j, temperature=TEMPERATURE):
    """Pure-JAX f32 reference mirroring the PyTorch forward."""
    zi = z_i / jnp.maximum(jnp.linalg.norm(z_i, axis=1, keepdims=True), EPS)
    zj = z_j / jnp.maximum(jnp.linalg.norm(z_j, axis=1, keepdims=True), EPS)
    z = jnp.concatenate([zi, zj], axis=0)
    n = z.shape[0]
    e = jnp.exp(z @ z.T / temperature)
    denom = jnp.sum(e * (1.0 - jnp.eye(n, dtype=e.dtype)), axis=1)
    pos = jnp.exp(jnp.sum(zi * zj, axis=1) / temperature)
    pos2 = jnp.concatenate([pos, pos], axis=0)
    return jnp.mean(-jnp.log(pos2 / denom))


if __name__ == "__main__":
    # Small, deterministic inputs: batch=8, hidden=32.
    B, D = 8, 32
    key = jax.random.PRNGKey(0)
    k1, k2 = jax.random.split(key)
    z_i = jax.random.normal(k1, (B, D), dtype=jnp.float32)
    z_j = jax.random.normal(k2, (B, D), dtype=jnp.float32)

    loss = nt_xent_loss(z_i, z_j)
    jax.block_until_ready(loss)

    ref = nt_xent_reference(z_i, z_j)
    # bf16 MXU operands (f32 accumulation) => slightly looser tolerance than f32.
    assert jnp.allclose(loss, ref, rtol=2e-2, atol=2e-2), (loss, ref)

    print("KERNEL_OK")
</pallas_src>

<mosaic_0001>
module attributes {stable_mosaic.version = 11 : i64} {
  func.func @_normalize_kernel(%arg0: i32, %arg1: memref<8x128xf32, #tpu.memory_space<vmem>>, %arg2: memref<8x128xf32, #tpu.memory_space<vmem>>, %arg3: memref<2x8x128xbf16, #tpu.memory_space<vmem>>, %arg4: memref<1x8x128xf32, #tpu.memory_space<vmem>>) attributes {dimension_semantics = [#tpu.dimension_semantics<parallel>], iteration_bounds = array<i64: 1>, scalar_prefetch = 0 : i64, scratch_operands = 0 : i64, tpu.core_type = #tpu.core_type<tc>, window_params = [{transform_indices = @transform_0, window_bounds = array<i64: 8, 128>}, {transform_indices = @transform_1, window_bounds = array<i64: 8, 128>}, {transform_indices = @transform_2, window_bounds = array<i64: 2, 8, 128>}, {transform_indices = @transform_3, window_bounds = array<i64: 1, 8, 128>}]} {
    %c0 = arith.constant 0 : index
    %c0_0 = arith.constant 0 : index
    %0 = vector.load %arg1[%c0, %c0_0] : memref<8x128xf32, #tpu.memory_space<vmem>>, vector<8x128xf32>
    %c0_1 = arith.constant 0 : index
    %c0_2 = arith.constant 0 : index
    %1 = vector.load %arg2[%c0_1, %c0_2] : memref<8x128xf32, #tpu.memory_space<vmem>>, vector<8x128xf32>
    %2 = arith.mulf %0, %0 : vector<8x128xf32>
    %cst = arith.constant dense<0.000000e+00> : vector<8xf32>
    %3 = vector.multi_reduction <add>, %2, %cst [1] : vector<8x128xf32> to vector<8xf32>
    %4 = vector.shape_cast %3 : vector<8xf32> to vector<8x1xf32>
    %5 = math.sqrt %4 : vector<8x1xf32>
    %6 = arith.mulf %1, %1 : vector<8x128xf32>
    %cst_3 = arith.constant dense<0.000000e+00> : vector<8xf32>
    %7 = vector.multi_reduction <add>, %6, %cst_3 [1] : vector<8x128xf32> to vector<8xf32>
    %8 = vector.shape_cast %7 : vector<8xf32> to vector<8x1xf32>
    %9 = math.sqrt %8 : vector<8x1xf32>
    %cst_4 = arith.constant 9.99999996E-13 : f32
    %10 = vector.broadcast %cst_4 : f32 to vector<8x1xf32>
    %11 = arith.maximumf %5, %10 : vector<8x1xf32>
    %12 = vector.broadcast %11 : vector<8x1xf32> to vector<8x128xf32>
    %13 = arith.divf %0, %12 : vector<8x128xf32>
    %cst_5 = arith.constant 9.99999996E-13 : f32
    %14 = vector.broadcast %cst_5 : f32 to vector<8x1xf32>
    %15 = arith.maximumf %9, %14 : vector<8x1xf32>
    %16 = vector.broadcast %15 : vector<8x1xf32> to vector<8x128xf32>
    %17 = arith.divf %1, %16 : vector<8x128xf32>
    %18 = arith.truncf %13 : vector<8x128xf32> to vector<8x128xbf16>
    %c0_6 = arith.constant 0 : index
    %c0_7 = arith.constant 0 : index
    %c0_8 = arith.constant 0 : index
    %19 = vector.load %arg3[%c0_6, %c0_7, %c0_8] : memref<2x8x128xbf16, #tpu.memory_space<vmem>>, vector<1x8x128xbf16>
    %20 = vector.shape_cast %19 : vector<1x8x128xbf16> to vector<8x128xbf16>
    %21 = vector.shape_cast %18 : vector<8x128xbf16> to vector<1x8x128xbf16>
    tpu.vector_store %arg3[%c0_6, %c0_7, %c0_8], %21 {strides = array<i32>} : memref<2x8x128xbf16, #tpu.memory_space<vmem>>, vector<1x8x128xbf16>,
    %22 = arith.truncf %17 : vector<8x128xf32> to vector<8x128xbf16>
    %c1 = arith.constant 1 : index
    %c0_9 = arith.constant 0 : index
    %c0_10 = arith.constant 0 : index
    %23 = vector.load %arg3[%c1, %c0_9, %c0_10] : memref<2x8x128xbf16, #tpu.memory_space<vmem>>, vector<1x8x128xbf16>
    %24 = vector.shape_cast %23 : vector<1x8x128xbf16> to vector<8x128xbf16>
    %25 = vector.shape_cast %22 : vector<8x128xbf16> to vector<1x8x128xbf16>
    tpu.vector_store %arg3[%c1, %c0_9, %c0_10], %25 {strides = array<i32>} : memref<2x8x128xbf16, #tpu.memory_space<vmem>>, vector<1x8x128xbf16>,
    %26 = arith.mulf %13, %17 : vector<8x128xf32>
    %27 = vector.shape_cast %26 : vector<8x128xf32> to vector<1x8x128xf32>
    %cst_11 = arith.constant dense<0.000000e+00> : vector<1xf32>
    %28 = vector.multi_reduction <add>, %27, %cst_11 [1, 2] : vector<1x8x128xf32> to vector<1xf32>
    %29 = vector.shape_cast %28 : vector<1xf32> to vector<1x1x1xf32>
    %30 = vector.extract %29[0, 0, 0] : f32 from vector<1x1x1xf32>
    %cst_12 = arith.constant 2.000000e+00 : f32
    %31 = arith.mulf %30, %cst_12 : f32
    %32 = vector.broadcast %31 : f32 to vector<1x8x128xf32>
    %c0_13 = arith.constant 0 : index
    %c0_14 = arith.constant 0 : index
    %c0_15 = arith.constant 0 : index
    %33 = vector.load %arg4[%c0_13, %c0_14, %c0_15] : memref<1x8x128xf32, #tpu.memory_space<vmem>>, vector<1x8x128xf32>
    tpu.vector_store %arg4[%c0_13, %c0_14, %c0_15], %32 {strides = array<i32>} : memref<1x8x128xf32, #tpu.memory_space<vmem>>, vector<1x8x128xf32>,
    return
  }
  func.func @transform_0(%arg0: i32) -> (i32, i32) {
    %c0_i32 = arith.constant 0 : i32
    %c0_i32_0 = arith.constant 0 : i32
    return %arg0, %c0_i32 : i32, i32
  }
  func.func @transform_1(%arg0: i32) -> (i32, i32) {
    %c0_i32 = arith.constant 0 : i32
    %c0_i32_0 = arith.constant 0 : i32
    return %arg0, %c0_i32 : i32, i32
  }
  func.func @transform_2(%arg0: i32) -> (i32, i32, i32) {
    %c0_i32 = arith.constant 0 : i32
    %c0_i32_0 = arith.constant 0 : i32
    %c0_i32_1 = arith.constant 0 : i32
    return %c0_i32, %arg0, %c0_i32_0 : i32, i32, i32
  }
  func.func @transform_3(%arg0: i32) -> (i32, i32, i32) {
    %c0_i32 = arith.constant 0 : i32
    %c0_i32_0 = arith.constant 0 : i32
    %c0_i32_1 = arith.constant 0 : i32
    return %arg0, %c0_i32, %c0_i32_0 : i32, i32, i32
  }
}

</mosaic_0001>

<bundles_post_ra>
// kernel: tpu_custom_call.1
= control target key start
LH: loop header
LB: loop body
LE: loop exit
PB: predicated region body
PF: predicated region fallthrough
CT: control target
= control target key end

     0   :  { %9 = vsyncpa [#allocation3], 0  ;;  %s264_s0 = inlined_call_operand.hbm [shape: f32[8,128], index: 0, kind: input, shape index: {}]   ;;  %s265_s1 = inlined_call_operand.hbm [shape: f32[8,128], index: 1, kind: input, shape index: {}]   ;;  %s266_s2 = inlined_call_operand.hbm [shape: bf16[2,8,128], index: 2, kind: output, shape index: {0}]   ;;  %s267_s3 = inlined_call_operand.hbm [shape: f32[1,8,128], index: 3, kind: output, shape index: {1}]  }
   0x1   :  { %10 = vsyncpa [#allocation6], 0 }
   0x2   :  { %11 = vsyncpa [#allocation4], 0 }
   0x3   :  { %12 = vsyncpa [#allocation9], 0  ;;  %s226_s12 = smov [#allocation2]   ;;  %s227_s14 = smov [#allocation5]  }
   0x4   :  { %s19_s13 = sshll.u32 %s226_s12, 4  ;;  %s29_s15 = sshll.u32 %s227_s14, 4  ;;  %s20_s13 = int_to_ptr.vmem [resolvable:$true] %s19_s13  ;;  %s30_s15 = int_to_ptr.vmem [resolvable:$true] %s29_s15 }
   0x5   :  { %s146_s16 = scalar_lea.vmem %s20_s13, 128  ;;  %p151_p1 = scmp.lt.s32.totalorder %s20_s13, %s20_s13 }
   0x6   :  { %p147_p0 = scmp.ne.s32.totalorder %s20_s13, %s146_s16  ;;  %p152_p2 = scmp.lt.s32.totalorder %s146_s16, %s146_s16 }
   0x8   :  { %p153_p3 = por %p152_p2, %p151_p1 }
   0xa   :  { %p154_p4 = pnand %p153_p3, %p147_p0 }
   0xc   :  { %157 = shalt.err (!%p154_p4)
}
   0xd   :  { %22 = dma.hbm_to_vmem [thread:$0]  %s264_s0, 128, %s20_s13, [#allocation3]  }
   0xe   :  { %s166_s19 = scalar_lea.vmem %s30_s15, 128  ;;  %p171_p6 = scmp.lt.s32.totalorder %s30_s15, %s30_s15 }
   0xf   :  { %p167_p5 = scmp.ne.s32.totalorder %s30_s15, %s166_s19  ;;  %p172_p7 = scmp.lt.s32.totalorder %s166_s19, %s166_s19 }
  0x11   :  { %p173_p8 = por %p172_p7, %p171_p6 }
  0x13   :  { %p174_p9 = pnand %p173_p8, %p167_p5 }
  0x15   :  { %177 = shalt.err (!%p174_p9)
}
  0x16   :  { %32 = dma.hbm_to_vmem [thread:$0]  %s265_s1, 128, %s30_s15, [#allocation6]  }
  0x17   :  { %218 = dma.done.wait [#allocation3], 128  }
  0x18   :  { %219 = vsyncadd [#allocation3], 4294967168 }
  0x19   :  { %220 = dma.done.wait [#allocation6], 128  }
  0x1a   :  { %221 = vsyncadd [#allocation6], 4294967168  ;;  %v39_v0 = vld [vmem:[#allocation2] sm:$0xff]  ;;  %v40_v1 = vld [vmem:[#allocation5] sm:$0xff]  ;;  %s228_s0 = smov [#allocation7]  }
  0x1b   :  { %v41_v2 = vmul.f32 %v39_v0, %v39_v0  ;;  %v51_v3 = vmul.f32 %v40_v1, %v40_v1  ;;  %s90_s1 = sshll.u32 %s228_s0, 4  ;;  %s91_s1 = int_to_ptr.vmem [resolvable:$true] %s90_s1 }
  0x1c   :  { %s178_s22 = scalar_lea.vmem %s91_s1, 128  ;;  %p183_p11 = scmp.lt.s32.totalorder %s91_s1, %s91_s1 }
  0x1d   :  { %42 = vadd.xlane.f32.xlu0 %v41_v2  ;;  %p179_p10 = scmp.ne.s32.totalorder %s91_s1, %s178_s22  ;;  %p184_p12 = scmp.lt.s32.totalorder %s178_s22, %s178_s22 }
  0x1f   :  { %p185_p13 = por %p184_p12, %p183_p11 }
  0x21   :  { %52 = vadd.xlane.f32.xlu0 %v51_v3  ;;  %p186_p0 = pnand %p185_p13, %p179_p10 }
  0xa6   :  { %v43_v4 = vpop.xlane.xlu0 %42 }
  0xa7   :  { %130 = vrsqrt.f32 %v43_v4  ;;  %vm46_vm0 = vcmp.eq.f32.partialorder %v43_v4, inf  ;;  %v49_v8 = vand.u32 2147483648, %v43_v4  ;;  %vm48_vm1 = vcmp.eq.f32.partialorder %v43_v4, 0.0 }
  0xaa   :  { %v53_v5 = vpop.xlane.xlu0 %52 }
  0xab   :  { %132 = vrsqrt.f32 %v53_v5  ;;  %vm56_vm2 = vcmp.eq.f32.partialorder %v53_v5, inf  ;;  %v59_v14 = vand.u32 2147483648, %v53_v5  ;;  %vm58_vm3 = vcmp.eq.f32.partialorder %v53_v5, 0.0 }
  0xb4   :  { %v131_v6 = vpop.eup %130 }
  0xb5   :  { %v45_v7 = vmul.f32 %v131_v6, %v43_v4 }
  0xb7   :  { %v47_v9 = vsel %vm46_vm0, %v43_v4, %v45_v7 }
  0xb8   :  { %v133_v10 = vpop.eup %132  ;;  %v50_v11 = vsel %vm48_vm1, %v49_v8, %v47_v9 }
  0xb9   :  { %v61_v12 = vmax.f32 %v50_v11, 1e-12  ;;  %v55_v13 = vmul.f32 %v133_v10, %v53_v5 }
  0xbb   :  { %v57_v15 = vsel %vm56_vm2, %v53_v5, %v55_v13  ;;  %134 = vrcp.f32 %v61_v12 }
  0xbc   :  { %v60_v16 = vsel %vm58_vm3, %v59_v14, %v57_v15 }
  0xbd   :  { %v64_v17 = vmax.f32 %v60_v16, 1e-12 }
  0xbf   :  { %136 = vrcp.f32 %v64_v17 }
  0xc8   :  { %v135_v18 = vpop.eup %134 }
  0xc9   :  { %v63_v20 = vmul.f32 %v135_v18, %v39_v0 }
  0xcc   :  { %v137_v19 = vpop.eup %136 }
  0xcd   :  { %v66_v21 = vmul.f32 %v137_v19, %v40_v1 }
  0xcf   :  { %v72_v22 = vmul.f32 %v66_v21, %v63_v20  ;;  %v120_v23 = vpack.c.bf16 %v66_v21, %v63_v20 }
  0xd1   :  { %73 = vadd.xlane.f32.xlu1 %v72_v22  ;;  %121 = vst [vmem:[#allocation7] sm:$0xff] %v120_v23  }
  0xd2   :  { %189 = shalt.err (!%p186_p0)
}
  0xd3   :  { %s229_s23 = smov 64   ;;  %s230_s24 = smov 4  }
  0xd4   :  { %96 = dma.vmem_to_hbm [thread:$0]  %s91_s1, 128, %s266_s2, [#allocation4], %s229_s23, %s229_s23, %s230_s24  }
  0xd5   :  { %s231_s27 = smov [#allocation8]  }
  0xd6   :  { %s103_s28 = sshll.u32 %s231_s27, 4  ;;  %s104_s28 = int_to_ptr.vmem [resolvable:$true] %s103_s28 }
  0xd7   :  { %s198_s4 = scalar_lea.vmem %s104_s28, 128  ;;  %p203_p2 = scmp.lt.s32.totalorder %s104_s28, %s104_s28 }
  0xd8   :  { %p199_p1 = scmp.ne.s32.totalorder %s104_s28, %s198_s4  ;;  %p204_p3 = scmp.lt.s32.totalorder %s198_s4, %s198_s4 }
  0xda   :  { %p205_p4 = por %p204_p3, %p203_p2 }
  0xdc   :  { %p206_p5 = pnand %p205_p4, %p199_p1 }
 0x15a   :  { %v74_v24 = vpop.xlane.xlu1 %73 }
 0x15b   :  { %v75_v25 = vrot.slane %v74_v24, 4 }
 0x15d   :  { %v76_v26 = vadd.f32 %v75_v25, %v74_v24 }
 0x15f   :  { %v77_v27 = vrot.slane %v76_v26, 2 }
 0x161   :  { %v78_v28 = vadd.f32 %v77_v27, %v76_v26 }
 0x163   :  { %v79_v29 = vrot.slane %v78_v28, 1 }
 0x165   :  { %v80_v30 = vadd.f32 %v79_v29, %v78_v28 }
 0x167   :  { %122 = vpush %v80_v30 }
 0x198   :  { %s123_s29 = spop %122 }
 0x199   :  { %s82_s30 = smul.f32 2.0, %s123_s29 }
 0x19b   :  { %v83_v31 = vstv %s82_s30 }
 0x19c   :  { %84 = vst [vmem:[#allocation8] sm:$0xff] %v83_v31 }
 0x19d   :  { %209 = shalt.err (!%p206_p5)
}
 0x19e   :  { %106 = dma.vmem_to_hbm [thread:$0]  %s104_s28, 128, %s267_s3, [#allocation9]  }
 0x19f   :  { %222 = dma.done.wait [#allocation4], 128  }
 0x1a0   :  { %223 = vsyncadd [#allocation4], 4294967168 }
 0x1a1   :  { %224 = dma.done.wait [#allocation9], 128  }
 0x1a2   :  { %225 = vsyncadd [#allocation9], 4294967168 }
 0x1a3   :  { %113 = vsyncpa [#allocation3], 1 }
 0x1a4   :  { %114 = vsyncpa [#allocation6], 1 }
 0x1a5   :  { %115 = vsyncpa [#allocation4], 1 }
 0x1a6   :  { %116 = vsyncpa [#allocation9], 1 }

</bundles_post_ra>
